<compile_context>
chip_gen: v7x
topology: tpu7x:2x2x1
jax: 0.10.0
libtpu: 0.0.40
codegen_flags: <defaults>
</compile_context>

<pallas_src>
import jax
import jax.numpy as jnp
from jax.experimental import pallas as pl
from jax.experimental.pallas import tpu as pltpu


def fused_concat_conv_kernel(x_ref, wb_ref, o_ref):
    # x_ref : (N, C, HW)        f32  input activations (HW lane-dense)
    # wb_ref: (C+1, 2C, 1)      f32  rows 0..C-1 = columns of fused weight, row C = fused bias
    # o_ref : (N, 2C, HW)       f32  rows 0..C-1 = conv1(x), rows C..2C-1 = conv2(conv1(x))
    x = x_ref[...]
    _, c_in, _ = x.shape

    # Start from the bias (broadcasts (1, 2C, 1) -> (N, 2C, HW) in the adds below).
    acc = wb_ref[c_in][None, :, :]
    # Tiny contraction (C == 2): unrolled VPU broadcast-multiply-adds, no MXU latency.
    for c in range(c_in):
        acc = acc + wb_ref[c][None, :, :] * x[:, c:c + 1, :]

    o_ref[...] = acc  # single lane/sublane-dense full-block store


def concatenation_forward(x, w1, b1, w2, b2):
    N, C, H, W = x.shape
    HW = H * W
    x_flat = x.reshape(N, C, HW)  # contiguous view; no dtype copy (inputs already f32)

    # Fuse conv2(conv1(x)):  x1 = W1 x + b1 ;  x2 = (W2 W1) x + (W2 b1 + b2)
    w_f = jnp.concatenate([w1, w2 @ w1], axis=0)        # (2C, C)
    b_f = jnp.concatenate([b1, w2 @ b1 + b2], axis=0)   # (2C,)
    # Pack all parameters into one tiny operand: (C+1, 2C, 1)
    wb = jnp.concatenate([w_f.T[:, :, None], b_f[None, :, None]], axis=0)

    out = pl.pallas_call(
        fused_concat_conv_kernel,
        out_shape=jax.ShapeDtypeStruct((N, 2 * C, HW), jnp.float32),
        grid=(1,),  # whole problem in one VMEM-resident block (fits v5e/v6e/v7x easily)
        in_specs=[
            pl.BlockSpec((N, C, HW), lambda i: (0, 0, 0)),
            pl.BlockSpec((C + 1, 2 * C, 1), lambda i: (0, 0, 0)),
        ],
        out_specs=pl.BlockSpec((N, 2 * C, HW), lambda i: (0, 0, 0)),
        compiler_params=pltpu.CompilerParams(dimension_semantics=("arbitrary",)),
    )(x_flat, wb)

    # (N, 2C, HW) -> (2, N, C, H, W) -> (2N, C, H, W)  ==  torch.cat([x1, x2], dim=0)
    return out.reshape(N, 2, C, H, W).transpose(1, 0, 2, 3, 4).reshape(2 * N, C, H, W)


def reference_forward(x, w1, b1, w2, b2):
    x1 = jnp.einsum("oc,nchw->nohw", w1, x) + b1[None, :, None, None]
    x2 = jnp.einsum("oc,nchw->nohw", w2, x1) + b2[None, :, None, None]
    return jnp.concatenate([x1, x2], axis=0)


if __name__ == "__main__":
    key = jax.random.PRNGKey(0)
    k_x, k_w1, k_b1, k_w2, k_b2 = jax.random.split(key, 5)

    # Module fixes channels to 2 (Conv2d(2, 2, kernel_size=1)).
    N, C, H, W = 2, 2, 16, 16
    x = jax.random.normal(k_x, (N, C, H, W), dtype=jnp.float32)

    # PyTorch-style Conv2d(2,2,1) params: uniform(-1/sqrt(fan_in), +1/sqrt(fan_in))
    bound = 1.0 / jnp.sqrt(jnp.float32(C))
    w1 = jax.random.uniform(k_w1, (C, C), jnp.float32, -bound, bound)  # (out, in) of 1x1 conv
    b1 = jax.random.uniform(k_b1, (C,), jnp.float32, -bound, bound)
    w2 = jax.random.uniform(k_w2, (C, C), jnp.float32, -bound, bound)
    b2 = jax.random.uniform(k_b2, (C,), jnp.float32, -bound, bound)

    out = concatenation_forward(x, w1, b1, w2, b2)
    out = jax.block_until_ready(out)

    ref = reference_forward(x, w1, b1, w2, b2)
    assert out.shape == (2 * N, C, H, W), out.shape
    assert jnp.allclose(out, ref, atol=1e-5, rtol=1e-5), "mismatch vs reference"

    print("KERNEL_OK")
</pallas_src>

<mosaic_0001>
module attributes {stable_mosaic.version = 11 : i64} {
  func.func @fused_concat_conv_kernel(%arg0: i32, %arg1: memref<2x2x256xf32, #tpu.memory_space<vmem>>, %arg2: memref<3x4x1xf32, #tpu.memory_space<vmem>>, %arg3: memref<2x4x256xf32, #tpu.memory_space<vmem>>) attributes {dimension_semantics = [#tpu.dimension_semantics<arbitrary>], iteration_bounds = array<i64: 1>, scalar_prefetch = 0 : i64, scratch_operands = 0 : i64, tpu.core_type = #tpu.core_type<tc>, window_params = [{pipeline_mode = #tpu.pipeline_mode<synchronous>, transform_indices = @transform_0, window_bounds = array<i64: 2, 2, 256>}, {pipeline_mode = #tpu.pipeline_mode<synchronous>, transform_indices = @transform_1, window_bounds = array<i64: 3, 4, 1>}, {pipeline_mode = #tpu.pipeline_mode<synchronous>, transform_indices = @transform_2, window_bounds = array<i64: 2, 4, 256>}]} {
    %c0 = arith.constant 0 : index
    %c0_0 = arith.constant 0 : index
    %c0_1 = arith.constant 0 : index
    %0 = vector.load %arg1[%c0, %c0_0, %c0_1] : memref<2x2x256xf32, #tpu.memory_space<vmem>>, vector<2x2x256xf32>
    %c2 = arith.constant 2 : index
    %c0_2 = arith.constant 0 : index
    %c0_3 = arith.constant 0 : index
    %1 = vector.load %arg2[%c2, %c0_2, %c0_3] : memref<3x4x1xf32, #tpu.memory_space<vmem>>, vector<1x4x1xf32>
    %2 = vector.shape_cast %1 : vector<1x4x1xf32> to vector<4x1xf32>
    %3 = vector.shape_cast %2 : vector<4x1xf32> to vector<1x4x1xf32>
    %c0_4 = arith.constant 0 : index
    %c0_5 = arith.constant 0 : index
    %c0_6 = arith.constant 0 : index
    %4 = vector.load %arg2[%c0_4, %c0_5, %c0_6] : memref<3x4x1xf32, #tpu.memory_space<vmem>>, vector<1x4x1xf32>
    %5 = vector.shape_cast %4 : vector<1x4x1xf32> to vector<4x1xf32>
    %6 = vector.shape_cast %5 : vector<4x1xf32> to vector<1x4x1xf32>
    %7 = vector.extract_strided_slice %0 {offsets = [0, 0, 0], sizes = [2, 1, 256], strides = [1, 1, 1]} : vector<2x2x256xf32> to vector<2x1x256xf32>
    %8 = vector.broadcast %6 : vector<1x4x1xf32> to vector<2x4x256xf32>
    %9 = vector.broadcast %7 : vector<2x1x256xf32> to vector<2x4x256xf32>
    %10 = arith.mulf %8, %9 : vector<2x4x256xf32>
    %11 = vector.broadcast %3 : vector<1x4x1xf32> to vector<2x4x256xf32>
    %12 = arith.addf %11, %10 : vector<2x4x256xf32>
    %c1 = arith.constant 1 : index
    %c0_7 = arith.constant 0 : index
    %c0_8 = arith.constant 0 : index
    %13 = vector.load %arg2[%c1, %c0_7, %c0_8] : memref<3x4x1xf32, #tpu.memory_space<vmem>>, vector<1x4x1xf32>
    %14 = vector.shape_cast %13 : vector<1x4x1xf32> to vector<4x1xf32>
    %15 = vector.shape_cast %14 : vector<4x1xf32> to vector<1x4x1xf32>
    %16 = vector.extract_strided_slice %0 {offsets = [0, 1, 0], sizes = [2, 1, 256], strides = [1, 1, 1]} : vector<2x2x256xf32> to vector<2x1x256xf32>
    %17 = vector.broadcast %15 : vector<1x4x1xf32> to vector<2x4x256xf32>
    %18 = vector.broadcast %16 : vector<2x1x256xf32> to vector<2x4x256xf32>
    %19 = arith.mulf %17, %18 : vector<2x4x256xf32>
    %20 = arith.addf %12, %19 : vector<2x4x256xf32>
    %c0_9 = arith.constant 0 : index
    %c0_10 = arith.constant 0 : index
    %c0_11 = arith.constant 0 : index
    %21 = vector.load %arg3[%c0_9, %c0_10, %c0_11] : memref<2x4x256xf32, #tpu.memory_space<vmem>>, vector<2x4x256xf32>
    tpu.vector_store %arg3[%c0_9, %c0_10, %c0_11], %20 {strides = array<i32>} : memref<2x4x256xf32, #tpu.memory_space<vmem>>, vector<2x4x256xf32>,
    return
  }
  func.func @transform_0(%arg0: i32) -> (i32, i32, i32) {
    %c0_i32 = arith.constant 0 : i32
    %c0_i32_0 = arith.constant 0 : i32
    %c0_i32_1 = arith.constant 0 : i32
    %c0_i32_2 = arith.constant 0 : i32
    return %c0_i32, %c0_i32_0, %c0_i32_1 : i32, i32, i32
  }
  func.func @transform_1(%arg0: i32) -> (i32, i32, i32) {
    %c0_i32 = arith.constant 0 : i32
    %c0_i32_0 = arith.constant 0 : i32
    %c0_i32_1 = arith.constant 0 : i32
    %c0_i32_2 = arith.constant 0 : i32
    return %c0_i32, %c0_i32_0, %c0_i32_1 : i32, i32, i32
  }
  func.func @transform_2(%arg0: i32) -> (i32, i32, i32) {
    %c0_i32 = arith.constant 0 : i32
    %c0_i32_0 = arith.constant 0 : i32
    %c0_i32_1 = arith.constant 0 : i32
    %c0_i32_2 = arith.constant 0 : i32
    return %c0_i32, %c0_i32_0, %c0_i32_1 : i32, i32, i32
  }
}

</mosaic_0001>

<bundles_post_ra>
// kernel: tpu_custom_call.1
= control target key start
LH: loop header
LB: loop body
LE: loop exit
PB: predicated region body
PF: predicated region fallthrough
CT: control target
= control target key end

     0   :  { %v182_v2 = vmov 0   ;;  %s228_s0 = inlined_call_operand.vmem [shape: f32[2,2,256], index: 0, kind: input, shape index: {}]   ;;  %s229_s1 = inlined_call_operand.vmem [shape: f32[3,4,1], index: 1, kind: input, shape index: {}]   ;;  %s230_s2 = inlined_call_operand.hbm [shape: f32[2,4,256], index: 2, kind: output, shape index: {}]  }
   0x1   :  { %v16_v0 = vld [vmem:[%s229_s1] sm:$0xf]  ;;  %v151_v1 = vld [vmem:[%s229_s1 + $0x4] sm:$0xf]  ;;  %156 = vset.pattern.permute.xlu0 %v182_v2  ;;  %157 = vset.pattern.permute.xlu1 %v182_v2 }
   0x2   :  { %19 = vperm.xlu0 %156, %v16_v0   ;;  %77 = vperm.xlu1 %157, %v151_v1  }
   0x3   :  { %7 = vsyncpa [#allocation3], 0  ;;  %v150_v3 = vld [vmem:[%s229_s1 + $0x8] sm:$0xf]  ;;  %v24_v4 = vlaneseq  ;;  %v12_v10 = vld [vmem:[%s228_s0] sm:$0xf] }
   0x4   :  { %v13_v11 = vld [vmem:[%s228_s0 + $0x4] sm:$0xf]  ;;  %s183_s0 = smov [#allocation2]  }
   0x5   :  { %v25_v5 = vshrl.u32 %v24_v4, 7  ;;  %s139_s1 = sshll.u32 %s183_s0, 4  ;;  %s140_s1 = int_to_ptr.vmem [resolvable:$true] %s139_s1 }
   0x6   :  { %66 = vperm.xlu0 %156, %v150_v3   ;;  %s158_s19 = scalar_lea.vmem %s140_s1, 256  ;;  %p163_p1 = scmp.lt.s32.totalorder %s140_s1, %s140_s1 }
   0x7   :  { %v82_v6 = vsub.s32 1, %v25_v5  ;;  %v86_v7 = vsub.s32 3, %v25_v5  ;;  %v26_v8 = vsub.s32 0, %v25_v5  ;;  %v30_v9 = vsub.s32 2, %v25_v5  ;;  %p159_p0 = scmp.ne.s32.totalorder %s140_s1, %s158_s19  ;;  %p164_p2 = scmp.lt.s32.totalorder %s158_s19, %s158_s19 }
   0x9   :  { %v83_v12 = vrot.slane %v12_v10, %v82_v6  ;;  %v87_v13 = vrot.slane %v12_v10, %v86_v7  ;;  %v91_v14 = vrot.slane %v13_v11, %v82_v6  ;;  %v95_v15 = vrot.slane %v13_v11, %v86_v7  ;;  %p165_p3 = por %p164_p2, %p163_p1 }
   0xa   :  { %v27_v16 = vrot.slane %v12_v10, %v26_v8  ;;  %v31_v17 = vrot.slane %v12_v10, %v30_v9  ;;  %v35_v18 = vrot.slane %v13_v11, %v26_v8  ;;  %v39_v19 = vrot.slane %v13_v11, %v30_v9 }
   0xb   :  { %v103_v20 = vrot.slane %v83_v12, %v82_v6  ;;  %v107_v21 = vrot.slane %v87_v13, %v82_v6  ;;  %v111_v22 = vrot.slane %v91_v14, %v82_v6  ;;  %v115_v23 = vrot.slane %v95_v15, %v82_v6  ;;  %p166_p4 = pnand %p165_p3, %p159_p0 }
   0xc   :  { %v47_v24 = vrot.slane %v27_v16, %v26_v8  ;;  %v51_v25 = vrot.slane %v31_v17, %v26_v8  ;;  %v55_v26 = vrot.slane %v35_v18, %v26_v8  ;;  %v59_v27 = vrot.slane %v39_v19, %v26_v8 }
  0x81   :  { %v20_v28 = vpop.permute.xlu0 %19  ;;  %v78_v29 = vpop.permute.xlu1 %77 }
  0x82   :  { %v116_v30 = vmul.f32 %v103_v20, %v78_v29  ;;  %v117_v31 = vmul.f32 %v107_v21, %v78_v29  ;;  %v118_v32 = vmul.f32 %v111_v22, %v78_v29  ;;  %v119_v33 = vmul.f32 %v115_v23, %v78_v29 }
  0x83   :  { %v60_v34 = vmul.f32 %v47_v24, %v20_v28  ;;  %v61_v35 = vmul.f32 %v51_v25, %v20_v28  ;;  %v62_v36 = vmul.f32 %v55_v26, %v20_v28  ;;  %v63_v37 = vmul.f32 %v59_v27, %v20_v28 }
  0x85   :  { %v67_v38 = vpop.permute.xlu0 %66 }
  0x86   :  { %v69_v39 = vadd.f32 %v67_v38, %v60_v34  ;;  %v70_v40 = vadd.f32 %v67_v38, %v61_v35  ;;  %v71_v41 = vadd.f32 %v67_v38, %v62_v36  ;;  %v72_v42 = vadd.f32 %v67_v38, %v63_v37 }
  0x88   :  { %v120_v43 = vadd.f32 %v116_v30, %v69_v39  ;;  %v121_v44 = vadd.f32 %v117_v31, %v70_v40  ;;  %v122_v45 = vadd.f32 %v118_v32, %v71_v41  ;;  %v123_v46 = vadd.f32 %v119_v33, %v72_v42 }
  0x8a   :  { %v128_v47 = vcombine.low %v120_v43, %v121_v44  ;;  %v129_v48 = vcombine.low %v122_v45, %v123_v46 }
  0x8c   :  { %132 = vst [vmem:[#allocation2] sm:$0xff] %v128_v47  ;;  %133 = vst [vmem:[#allocation2 + $0x8] sm:$0xff] %v129_v48 }
  0x8d   :  { %169 = shalt.err (!%p166_p4)
}
  0x8e   :  { %s170_s22 = scalar_lea.hbm %s230_s2, 256 }
  0x8f   :  { %p171_p5 = scmp.ne.s32.totalorder %s230_s2, %s170_s22  ;;  %p174_p6 = scmp.lt.u32.totalorder %s170_s22, %s230_s2 }
  0x91   :  { %p176_p7 = pnand %p174_p6, %p171_p5 }
  0x93   :  { %179 = shalt.err (!%p176_p7)
}
  0x94   :  { %s184_s27 = smov 128   ;;  %s185_s28 = smov 8  }
  0x95   :  { %145 = dma.vmem_to_hbm [thread:$0]  %s140_s1, 256, %s230_s2, [#allocation3], %s184_s27, %s184_s27, %s185_s28  }
  0x96   :  { %180 = dma.done.wait [#allocation3], 256  }
  0x97   :  { %181 = vsyncadd [#allocation3], 4294967040 }
  0x98   :  { %149 = vsyncpa [#allocation3], 1 }

</bundles_post_ra>
